<compile_context>
chip_gen: v6e
topology: v6e:2x2x1
jax: 0.10.0
libtpu: 0.0.40
codegen_flags: <defaults>
</compile_context>

<pallas_src>
import functools

import jax
import jax.numpy as jnp
from jax.experimental import pallas as pl
from jax.experimental.pallas import tpu as pltpu


def _simam_kernel(x_ref, o_ref, *, inv_hw, n, e_lambda):
    # x_ref: (rows_per_block, HW) tile in VMEM; each row is one (b, c) plane.
    x = x_ref[...].astype(jnp.float32)

    # Fused one-pass statistics: both cross-lane reductions issued together.
    sum_x = jnp.sum(x, axis=-1, keepdims=True)
    sum_x2 = jnp.sum(x * x, axis=-1, keepdims=True)
    mu = sum_x * inv_hw
    s = sum_x2 - sum_x * mu              # == sum((x - mu)^2) over the spatial plane

    d2 = (x - mu) * (x - mu)             # (x - mu)^2, per element
    denom = 4.0 * (s / n + e_lambda)     # one value per row

    # EUP reciprocal (per-row) + one Newton step -> ~f32 accuracy, then N multiplies
    # instead of N divides.
    inv = pl.reciprocal(denom, approx=True)
    inv = inv * (2.0 - denom * inv)

    y = d2 * inv + 0.5
    o_ref[...] = jax.nn.sigmoid(y).astype(o_ref.dtype)


def _choose_rows_per_block(bc, hw, itemsize, target_block_bytes):
    """Pick a sublane-aligned row count giving ~target_block_bytes per input block."""
    align = {4: 8, 2: 32, 1: 32}.get(itemsize, 8)   # f32 sublane=8; bf16 packs 16 (use 32)
    rows = max(align, (target_block_bytes // max(1, hw * itemsize)) // align * align)
    bc_aligned = ((bc + align - 1) // align) * align
    rows = min(rows, bc_aligned)
    # Keep the grid >= 2 blocks when possible so v7x's 2 TensorCores both get work.
    if rows >= bc_aligned and bc_aligned > align:
        rows = max(align, ((bc_aligned // 2 + align - 1) // align) * align)
    return int(rows)


def simam(x, e_lambda=1e-4, rows_per_block=None, target_block_bytes=2 << 20):
    """x: (B, C, H, W) -> attention weights (B, C, H, W); same semantics as SimAM.forward."""
    b, c, h, w = x.shape
    hw = h * w
    n = float(hw - 1)                    # NOTE: hw == 1 divides by zero, same as PyTorch
    bc = b * c
    itemsize = jnp.dtype(x.dtype).itemsize

    x2d = x.reshape(bc, hw)

    if rows_per_block is None:
        rows_per_block = _choose_rows_per_block(bc, hw, itemsize, target_block_bytes)
    grid = (pl.cdiv(bc, rows_per_block),)

    # Leave headroom for double-buffered in+out blocks plus f32 intermediates;
    # stays within v7x's 64 MiB physical VMEM for the ~2 MiB default blocks.
    block_bytes = rows_per_block * hw * itemsize
    vmem_limit = int(min(100 << 20, max(32 << 20, 10 * block_bytes)))

    kernel = functools.partial(
        _simam_kernel, inv_hw=1.0 / hw, n=n, e_lambda=float(e_lambda)
    )

    out2d = pl.pallas_call(
        kernel,
        out_shape=jax.ShapeDtypeStruct((bc, hw), x.dtype),
        grid_spec=pltpu.PrefetchScalarGridSpec(
            num_scalar_prefetch=0,
            grid=grid,
            in_specs=[pl.BlockSpec((rows_per_block, hw), lambda i: (i, 0))],
            out_specs=pl.BlockSpec((rows_per_block, hw), lambda i: (i, 0)),
        ),
        compiler_params=pltpu.CompilerParams(
            dimension_semantics=("parallel",),
            vmem_limit_bytes=vmem_limit,
        ),
    )(x2d)

    return out2d.reshape(b, c, h, w)


def simam_ref(x, e_lambda=1e-4):
    b, c, h, w = x.shape
    n = w * h - 1
    mu = jnp.mean(x, axis=(2, 3), keepdims=True)
    d2 = (x - mu) ** 2
    y = d2 / (4 * (jnp.sum(d2, axis=(2, 3), keepdims=True) / n + e_lambda)) + 0.5
    return jax.nn.sigmoid(y)


if __name__ == "__main__":
    key = jax.random.PRNGKey(0)
    x = jax.random.normal(key, (2, 4, 16, 16), dtype=jnp.float32)

    out = simam(x)
    out = jax.block_until_ready(out)

    ref = simam_ref(x)
    assert out.shape == x.shape
    # 1e-4 tolerance: approx EUP reciprocal + Newton refinement is ~f32-accurate,
    # but leaves a little margin vs. the exact-divide reference.
    assert jnp.allclose(out, ref, atol=1e-4, rtol=1e-4)
    print("KERNEL_OK")
</pallas_src>

<mosaic_0001>
module attributes {stable_mosaic.version = 11 : i64} {
  func.func @_simam_kernel(%arg0: i32, %arg1: memref<8x256xf32, #tpu.memory_space<vmem>>, %arg2: memref<8x256xf32, #tpu.memory_space<vmem>>) attributes {dimension_semantics = [#tpu.dimension_semantics<parallel>], iteration_bounds = array<i64: 1>, scalar_prefetch = 0 : i64, scratch_operands = 0 : i64, tpu.core_type = #tpu.core_type<tc>, window_params = [{transform_indices = @transform_0, window_bounds = array<i64: 8, 256>}, {transform_indices = @transform_1, window_bounds = array<i64: 8, 256>}]} {
    %c0 = arith.constant 0 : index
    %c0_0 = arith.constant 0 : index
    %0 = vector.load %arg1[%c0, %c0_0] : memref<8x256xf32, #tpu.memory_space<vmem>>, vector<8x256xf32>
    %cst = arith.constant dense<0.000000e+00> : vector<8xf32>
    %1 = vector.multi_reduction <add>, %0, %cst [1] : vector<8x256xf32> to vector<8xf32>
    %2 = vector.shape_cast %1 : vector<8xf32> to vector<8x1xf32>
    %3 = arith.mulf %0, %0 : vector<8x256xf32>
    %cst_1 = arith.constant dense<0.000000e+00> : vector<8xf32>
    %4 = vector.multi_reduction <add>, %3, %cst_1 [1] : vector<8x256xf32> to vector<8xf32>
    %5 = vector.shape_cast %4 : vector<8xf32> to vector<8x1xf32>
    %cst_2 = arith.constant 3.906250e-03 : f32
    %6 = vector.broadcast %cst_2 : f32 to vector<8x1xf32>
    %7 = arith.mulf %2, %6 : vector<8x1xf32>
    %8 = arith.mulf %2, %7 : vector<8x1xf32>
    %9 = arith.subf %5, %8 : vector<8x1xf32>
    %10 = vector.broadcast %7 : vector<8x1xf32> to vector<8x256xf32>
    %11 = arith.subf %0, %10 : vector<8x256xf32>
    %12 = vector.broadcast %7 : vector<8x1xf32> to vector<8x256xf32>
    %13 = arith.subf %0, %12 : vector<8x256xf32>
    %14 = arith.mulf %11, %13 : vector<8x256xf32>
    %cst_3 = arith.constant 2.550000e+02 : f32
    %15 = vector.broadcast %cst_3 : f32 to vector<8x1xf32>
    %16 = arith.divf %9, %15 : vector<8x1xf32>
    %cst_4 = arith.constant 9.99999974E-5 : f32
    %17 = vector.broadcast %cst_4 : f32 to vector<8x1xf32>
    %18 = arith.addf %16, %17 : vector<8x1xf32>
    %cst_5 = arith.constant 4.000000e+00 : f32
    %19 = vector.broadcast %cst_5 : f32 to vector<8x1xf32>
    %20 = arith.mulf %19, %18 : vector<8x1xf32>
    %21 = tpu.reciprocal %20 {approx = true} : vector<8x1xf32> -> vector<8x1xf32>
    %22 = arith.mulf %20, %21 : vector<8x1xf32>
    %cst_6 = arith.constant 2.000000e+00 : f32
    %23 = vector.broadcast %cst_6 : f32 to vector<8x1xf32>
    %24 = arith.subf %23, %22 : vector<8x1xf32>
    %25 = arith.mulf %21, %24 : vector<8x1xf32>
    %26 = vector.broadcast %25 : vector<8x1xf32> to vector<8x256xf32>
    %27 = arith.mulf %14, %26 : vector<8x256xf32>
    %cst_7 = arith.constant 5.000000e-01 : f32
    %28 = vector.broadcast %cst_7 : f32 to vector<8x256xf32>
    %29 = arith.addf %27, %28 : vector<8x256xf32>
    %30 = arith.negf %29 : vector<8x256xf32>
    %31 = math.exp %30 : vector<8x256xf32>
    %cst_8 = arith.constant 1.000000e+00 : f32
    %32 = vector.broadcast %cst_8 : f32 to vector<8x256xf32>
    %33 = arith.addf %32, %31 : vector<8x256xf32>
    %34 = arith.divf %32, %33 : vector<8x256xf32>
    %c0_9 = arith.constant 0 : index
    %c0_10 = arith.constant 0 : index
    %35 = vector.load %arg2[%c0_9, %c0_10] : memref<8x256xf32, #tpu.memory_space<vmem>>, vector<8x256xf32>
    tpu.vector_store %arg2[%c0_9, %c0_10], %34 {strides = array<i32>} : memref<8x256xf32, #tpu.memory_space<vmem>>, vector<8x256xf32>,
    return
  }
  func.func @transform_0(%arg0: i32) -> (i32, i32) {
    %c0_i32 = arith.constant 0 : i32
    %c0_i32_0 = arith.constant 0 : i32
    return %arg0, %c0_i32 : i32, i32
  }
  func.func @transform_1(%arg0: i32) -> (i32, i32) {
    %c0_i32 = arith.constant 0 : i32
    %c0_i32_0 = arith.constant 0 : i32
    return %arg0, %c0_i32 : i32, i32
  }
}

</mosaic_0001>

<bundles_post_ra>
// kernel: tpu_custom_call.1
= control target key start
LH: loop header
LB: loop body
LE: loop exit
PB: predicated region body
PF: predicated region fallthrough
CT: control target
= control target key end

     0   :  { %6 = vsyncpa [#allocation3], 0  ;;  %s155_s0 = inlined_call_operand.hbm [shape: f32[8,256], index: 0, kind: input, shape index: {}]   ;;  %s156_s1 = inlined_call_operand.hbm [shape: f32[8,256], index: 1, kind: output, shape index: {}]  }
   0x1   :  { %7 = vsyncpa [#allocation4], 0  ;;  %s137_s6 = smov [#allocation2]  }
   0x2   :  { %s14_s7 = sshll.u32 %s137_s6, 4  ;;  %s15_s7 = int_to_ptr.vmem [resolvable:$true] %s14_s7 }
   0x3   :  { %s101_s8 = scalar_lea.vmem %s15_s7, 256  ;;  %p106_p1 = scmp.lt.s32.totalorder %s15_s7, %s15_s7 }
   0x4   :  { %p102_p0 = scmp.ne.s32.totalorder %s15_s7, %s101_s8  ;;  %p107_p2 = scmp.lt.s32.totalorder %s101_s8, %s101_s8 }
   0x6   :  { %p108_p3 = por %p107_p2, %p106_p1 }
   0x8   :  { %p109_p4 = pnand %p108_p3, %p102_p0 }
   0xa   :  { %112 = shalt.err (!%p109_p4)
}
   0xb   :  { %17 = dma.hbm_to_vmem [thread:$0]  %s155_s0, 256, %s15_s7, [#allocation3]  }
   0xc   :  { %133 = dma.done.wait [#allocation3], 256  }
   0xd   :  { %134 = vsyncadd [#allocation3], 4294967040  ;;  %v21_v0 = vld [vmem:[#allocation2] sm:$0xff]  ;;  %v22_v1 = vld [vmem:[#allocation2 + $0x8] sm:$0xff]  ;;  %s138_s0 = smov [#allocation5]  }
   0xe   :  { %v23_v2 = vadd.f32 %v22_v1, %v21_v0  ;;  %v26_v3 = vmul.f32 %v21_v0, %v21_v0  ;;  %v27_v4 = vmul.f32 %v22_v1, %v22_v1  ;;  %s70_s11 = sshll.u32 %s138_s0, 4  ;;  %s71_s11 = int_to_ptr.vmem [resolvable:$true] %s70_s11 }
   0xf   :  { %s113_s12 = scalar_lea.vmem %s71_s11, 256  ;;  %p118_p6 = scmp.lt.s32.totalorder %s71_s11, %s71_s11 }
  0x10   :  { %24 = vadd.xlane.f32.xlu0 %v23_v2  ;;  %v28_v5 = vadd.f32 %v27_v4, %v26_v3  ;;  %p114_p5 = scmp.ne.s32.totalorder %s71_s11, %s113_s12  ;;  %p119_p7 = scmp.lt.s32.totalorder %s113_s12, %s113_s12 }
  0x12   :  { %p120_p8 = por %p119_p7, %p118_p6 }
  0x14   :  { %29 = vadd.xlane.f32.xlu0 %v28_v5  ;;  %p121_p9 = pnand %p120_p8, %p114_p5 }
  0x99   :  { %v25_v6 = vpop.xlane.xlu0 %24 }
  0x9a   :  { %v31_v7 = vmul.f32 0.00390625, %v25_v6 }
  0x9c   :  { %v32_v8 = vmul.f32 %v31_v7, %v25_v6  ;;  %v34_v15 = vsub.f32 %v21_v0, %v31_v7  ;;  %v35_v16 = vsub.f32 %v22_v1, %v31_v7 }
  0x9d   :  { %v30_v9 = vpop.xlane.xlu0 %29 }
  0x9e   :  { %v33_v10 = vsub.f32 %v30_v9, %v32_v8  ;;  %v36_v19 = vmul.f32 %v34_v15, %v34_v15  ;;  %v37_v20 = vmul.f32 %v35_v16, %v35_v16 }
  0xa0   :  { %v39_v11 = vmul.f32 0.003921569, %v33_v10 }
  0xa2   :  { %v40_v12 = vadd.f32 0.0001, %v39_v11 }
  0xa4   :  { %v41_v13 = vmul.f32 4.0, %v40_v12 }
  0xa6   :  { %83 = vrcp.f32 %v41_v13 }
  0xb3   :  { %v84_v14 = vpop.eup %83 }
  0xb4   :  { %v43_v17 = vmul.f32 %v84_v14, %v41_v13 }
  0xb6   :  { %v44_v18 = vsub.f32 2.0, %v43_v17 }
  0xb8   :  { %v45_v21 = vmul.f32 %v84_v14, %v44_v18 }
  0xba   :  { %v46_v22 = vmul.f32 %v45_v21, %v36_v19  ;;  %v47_v23 = vmul.f32 %v45_v21, %v37_v20 }
  0xbc   :  { %v48_v24 = vadd.f32 0.5, %v46_v22  ;;  %v49_v25 = vadd.f32 0.5, %v47_v23 }
  0xbe   :  { %v79_v26 = vmul.f32 -1.442695, %v48_v24  ;;  %v80_v27 = vmul.f32 -1.442695, %v49_v25 }
  0xc0   :  { %85 = vpow2.f32 %v79_v26 }
  0xc1   :  { %87 = vpow2.f32 %v80_v27 }
  0xcd   :  { %v86_v28 = vpop.eup %85 }
  0xce   :  { %v88_v29 = vpop.eup %87  ;;  %v56_v30 = vadd.f32 1.0, %v86_v28 }
  0xcf   :  { %v57_v31 = vadd.f32 1.0, %v88_v29 }
  0xd0   :  { %89 = vrcp.f32 %v56_v30 }
  0xd1   :  { %91 = vrcp.f32 %v57_v31 }
  0xdd   :  { %v90_v32 = vpop.eup %89 }
  0xde   :  { %v92_v33 = vpop.eup %91  ;;  %62 = vst [vmem:[#allocation5] sm:$0xff] %v90_v32 }
  0xdf   :  { %63 = vst [vmem:[#allocation5 + $0x8] sm:$0xff] %v92_v33 }
  0xe0   :  { %124 = shalt.err (!%p121_p9)
}
  0xe1   :  { %73 = dma.vmem_to_hbm [thread:$0]  %s71_s11, 256, %s156_s1, [#allocation4]  }
  0xe2   :  { %135 = dma.done.wait [#allocation4], 256  }
  0xe3   :  { %136 = vsyncadd [#allocation4], 4294967040 }
  0xe4   :  { %77 = vsyncpa [#allocation3], 1 }
  0xe5   :  { %78 = vsyncpa [#allocation4], 1 }

</bundles_post_ra>
